<compile_context>
chip_gen: v7x
topology: tpu7x:2x2x1
jax: 0.10.0
libtpu: 0.0.40
codegen_flags: <defaults>
</compile_context>

<pallas_src>
import math

import jax
import jax.numpy as jnp
from jax.experimental import pallas as pl
from jax.experimental.pallas import tpu as pltpu


# ----------------------------------------------------------------------------
# Kernels
# ----------------------------------------------------------------------------
def _se_single_pass_kernel(x_ref, w1_ref, b1_ref, w2_ref, b2_ref, o_ref):
    # x_ref: (1, R, L) — one batch element; L = lane width (C, possibly with a
    # few spatial positions folded in), R = remaining spatial positions.
    # Squeeze: f32-accumulating spatial sum straight off the ref (no f32 copy).
    p = jnp.sum(x_ref[...], axis=1, dtype=jnp.float32)                  # (1, L)
    # Compress (1x1 conv) + ReLU.  w1_ref already folds 1/(W*H) and the
    # lane-fold, so this is exactly mean @ W1^T + b1.
    y1 = jnp.maximum(
        jnp.dot(p, w1_ref[...], preferred_element_type=jnp.float32) + b1_ref[...],
        0.0)                                                            # (1, Cm)
    # Excitation (1x1 conv), no activation.  w2_ref/b2_ref are lane-tiled to L.
    y2 = jnp.dot(y1, w2_ref[...], preferred_element_type=jnp.float32) + b2_ref[...]
    # Scale in the input dtype (no full-block f32 temporary).
    gate = y2.astype(o_ref.dtype)                                       # (1, L)
    o_ref[...] = x_ref[...] * gate[:, None, :]


def _se_partial_sum_kernel(x_ref, s_ref):
    # Pass 1 of the tiled fallback: per-(batch, spatial-tile) channel sums.
    # Fully parallel: every grid step owns its own output block.
    s_ref[...] = jnp.sum(x_ref[...], axis=1, dtype=jnp.float32)[:, None, None, :]


def _se_scale_kernel(x_ref, g_ref, o_ref):
    # Pass 2 of the tiled fallback: re-stream x and apply the gate.
    gate = g_ref[...].astype(o_ref.dtype)                               # (1,1,L)
    o_ref[...] = x_ref[...] * gate


# ----------------------------------------------------------------------------
# Wrapper helpers
# ----------------------------------------------------------------------------
def _default_vmem_budget_bytes():
    """Generation-aware scoped-VMEM budget: 0.75 x per-core physical VMEM.

    v5e / v6e: 128 MiB physical -> ~96 MiB budget (the default scoped limit is
               far smaller, so vmem_limit_bytes is always set explicitly).
    v7x:       64 MiB per TensorCore -> ~48 MiB budget per core.
    """
    cap = None
    try:
        cap = int(pltpu.get_tpu_info().vmem_capacity_bytes)
    except Exception:
        cap = None
    if not cap or cap <= 0:
        cap = 64 * 1024 * 1024  # conservative fallback valid on every generation
    return int(0.75 * cap)


def _lane_fold(C, S):
    """Spatial positions folded into the lane axis so L = C*k is 128-aligned.

    lane l  <->  (spatial offset l // C, channel l % C); the fold is a free
    reshape because (B, W, H, C) is row-major contiguous.
    """
    if C % 128 == 0:
        return 1
    k = 128 // math.gcd(C, 128)  # smallest k with (k * C) % 128 == 0
    if S % k == 0:
        return k
    # TODO(synk): no copy-free fold exists (S % k != 0); keep L = C and accept
    # masked vst.msk stores rather than paying a full HBM copy of x to pad C.
    return 1


def _largest_aligned_divisor(rows, max_rows):
    """Largest multiple-of-8 divisor of `rows` that is <= max_rows (or None)."""
    best = None
    d = 8
    limit = min(rows, max_rows)
    while d <= limit:
        if rows % d == 0:
            best = d
        d += 8
    return best


# ----------------------------------------------------------------------------
# Wrapper
# ----------------------------------------------------------------------------
def se_forward(x, w1, b1, w2, b2, *, vmem_budget_bytes=None,
               force_tiled=False, tile_rows=None):
    """x: (B, W, H, C); w1: (Cm, C) 1x1-conv weight; b1: (Cm,); w2: (C, Cm); b2: (C,)."""
    B, W, H, C = x.shape
    Cm = w1.shape[0]
    S = W * H

    budget = int(vmem_budget_bytes) if vmem_budget_bytes is not None \
        else _default_vmem_budget_bytes()

    k = _lane_fold(C, S)
    L = C * k                 # lane width seen by the kernels
    R = S // k                # spatial rows per batch element
    x2 = x.reshape(B, R, L)   # free: row-major (B,W,H,C) == (B,S,C) == (B,R,L)
    itemsize = x.dtype.itemsize
    slab_bytes = R * L * itemsize

    def cparams(sem):
        return pltpu.CompilerParams(dimension_semantics=sem,
                                    vmem_limit_bytes=budget)

    # ---- single-pass admission ---------------------------------------------
    # Auto-pipeline holds 2x input block + 2x output block; the weight/bias
    # blocks never change index so they are counted once (not double-buffered).
    param_bytes = 4 * (2 * L * Cm + Cm + L)
    single_pass_vmem = 4 * slab_bytes + param_bytes + 8 * L * 4
    fits_single = single_pass_vmem <= budget
    # Small-batch guard (mostly v7x): with grid=(B,), fill/drain exposes a whole
    # slab DMA (~1/B of runtime) and at B=1 only one TensorCore gets work; the
    # tiled path's spatial "parallel" axis keeps both TCs busy.
    prefer_tiled_small_b = (B <= 2) and (slab_bytes >= (1 << 20))
    use_single = (not force_tiled) and fits_single and not prefer_tiled_small_b

    if use_single:
        # One-time JAX glue: fold 1/S, the lane-fold and the lane-tile into the
        # 1x1-conv weights so the kernel does plain row-vector @ matrix products.
        inv_s = 1.0 / float(S)
        w1f = jnp.tile(w1.astype(jnp.float32).T, (k, 1)) * inv_s        # (L, Cm)
        b1f = b1.astype(jnp.float32).reshape(1, Cm)                     # (1, Cm)
        w2f = jnp.tile(w2.astype(jnp.float32).T, (1, k))                # (Cm, L)
        b2f = jnp.tile(b2.astype(jnp.float32), k).reshape(1, L)         # (1, L)

        out2 = pl.pallas_call(
            _se_single_pass_kernel,
            out_shape=jax.ShapeDtypeStruct((B, R, L), x.dtype),
            grid_spec=pltpu.PrefetchScalarGridSpec(
                num_scalar_prefetch=0,
                grid=(B,),
                in_specs=[
                    pl.BlockSpec((1, R, L), lambda b: (b, 0, 0)),
                    pl.BlockSpec((L, Cm), lambda b: (0, 0)),
                    pl.BlockSpec((1, Cm), lambda b: (0, 0)),
                    pl.BlockSpec((Cm, L), lambda b: (0, 0)),
                    pl.BlockSpec((1, L), lambda b: (0, 0)),
                ],
                out_specs=pl.BlockSpec((1, R, L), lambda b: (b, 0, 0)),
            ),
            compiler_params=cparams(("parallel",)),
            cost_estimate=pl.CostEstimate(
                flops=int(2 * B * R * L + 4 * B * L * Cm),
                transcendentals=0,
                bytes_accessed=int(2 * B * slab_bytes + param_bytes)),
        )(x2, w1f, b1f, w2f, b2f)
        return out2.reshape(B, W, H, C)

    # ---- spatially tiled two-pass fallback ----------------------------------
    # Pass 1: partial channel sums (fully parallel).  Tiny gate math in JAX.
    # Pass 2: re-stream x and apply the gate.
    # The sum pass has no large output block, so it can take ~2x the rows of
    # the scale pass (bigger blocks -> closer to HBM roofline, fewer grid steps).
    max_rows_scale = max(8, min(budget // max(1, 4 * L * itemsize), 4096))
    max_rows_sum = max(8, min(budget // max(1, 2 * L * itemsize), 8192))

    Rp = R
    if tile_rows is not None:
        t_scale = t_sum = int(tile_rows)
        if R % t_scale != 0:
            Rp = ((R + t_scale - 1) // t_scale) * t_scale
    else:
        t_scale = _largest_aligned_divisor(R, max_rows_scale)
        if t_scale is not None:
            t_sum = _largest_aligned_divisor(R, max_rows_sum) or t_scale
        else:
            # Awkward R (e.g. prime): pad spatial rows with zeros up to a
            # sublane-aligned tile.  Zero rows are harmless because the true
            # 1/S is applied to the channel sums, and the padded output rows
            # are sliced off below.
            t_scale = max(8, (max_rows_scale // 8) * 8)
            t_sum = t_scale
            Rp = ((R + t_scale - 1) // t_scale) * t_scale

    x2w = x2 if Rp == R else jnp.pad(x2, ((0, 0), (0, Rp - R), (0, 0)))
    n_sum = Rp // t_sum
    n_scale = Rp // t_scale

    sums = pl.pallas_call(
        _se_partial_sum_kernel,
        out_shape=jax.ShapeDtypeStruct((B, n_sum, 1, L), jnp.float32),
        grid_spec=pltpu.PrefetchScalarGridSpec(
            num_scalar_prefetch=0,
            grid=(B, n_sum),
            in_specs=[pl.BlockSpec((1, t_sum, L), lambda b, t: (b, t, 0))],
            out_specs=pl.BlockSpec((1, 1, 1, L), lambda b, t: (b, t, 0, 0)),
        ),
        compiler_params=cparams(("parallel", "parallel")),
        cost_estimate=pl.CostEstimate(
            flops=int(B * Rp * L),
            transcendentals=0,
            bytes_accessed=int(B * Rp * L * itemsize + 4 * B * n_sum * L)),
    )(x2w)

    # Gate math in plain JAX: O(B*C*Cm) flops, negligible next to x traffic.
    ch_sums = jnp.sum(sums, axis=(1, 2))                                # (B, L)
    if k > 1:
        ch_sums = ch_sums.reshape(B, k, C).sum(axis=1)                  # (B, C)
    mean = ch_sums * (1.0 / float(S))
    w1f32 = w1.astype(jnp.float32)
    w2f32 = w2.astype(jnp.float32)
    y1 = jnp.maximum(mean @ w1f32.T + b1.astype(jnp.float32), 0.0)      # (B, Cm)
    y2 = y1 @ w2f32.T + b2.astype(jnp.float32)                          # (B, C)
    gate = jnp.tile(y2, (1, k)) if k > 1 else y2                        # (B, L)
    gate = gate.reshape(B, 1, L)

    out2 = pl.pallas_call(
        _se_scale_kernel,
        out_shape=jax.ShapeDtypeStruct((B, Rp, L), x.dtype),
        grid_spec=pltpu.PrefetchScalarGridSpec(
            num_scalar_prefetch=0,
            grid=(B, n_scale),
            in_specs=[
                pl.BlockSpec((1, t_scale, L), lambda b, t: (b, t, 0)),
                pl.BlockSpec((1, 1, L), lambda b, t: (b, 0, 0)),
            ],
            out_specs=pl.BlockSpec((1, t_scale, L), lambda b, t: (b, t, 0)),
        ),
        compiler_params=cparams(("parallel", "parallel")),
        cost_estimate=pl.CostEstimate(
            flops=int(B * Rp * L),
            transcendentals=0,
            bytes_accessed=int(2 * B * Rp * L * itemsize + 4 * B * L)),
    )(x2w, gate)

    if Rp != R:
        out2 = out2[:, :R, :]
    return out2.reshape(B, W, H, C)


# ----------------------------------------------------------------------------
# Pure-JAX reference mirroring the PyTorch forward
# ----------------------------------------------------------------------------
def se_reference(x, w1, b1, w2, b2):
    xf = x.astype(jnp.float32)
    m = jnp.mean(xf, axis=(1, 2))                          # (B, C)
    y1 = jnp.maximum(m @ w1.T + b1, 0.0)                   # (B, Cm)
    y2 = y1 @ w2.T + b2                                    # (B, C)  (no sigmoid)
    return (xf * y2[:, None, None, :]).astype(x.dtype)


if __name__ == "__main__":
    # Forward implies x is (b, w, h, c) with in_chnls a multiple of ratio=16.
    def make_inputs(seed, B, W, H, C, ratio, dtype):
        Cm = C // ratio
        kx, kw1, kb1, kw2, kb2 = jax.random.split(jax.random.PRNGKey(seed), 5)
        x = jax.random.normal(kx, (B, W, H, C), dtype=jnp.float32).astype(dtype)
        w1 = jax.random.normal(kw1, (Cm, C), dtype=jnp.float32) * 0.1   # compress
        b1 = jax.random.normal(kb1, (Cm,), dtype=jnp.float32) * 0.1
        w2 = jax.random.normal(kw2, (C, Cm), dtype=jnp.float32) * 0.1   # excitation
        b2 = jax.random.normal(kb2, (C,), dtype=jnp.float32) * 0.1
        return x, w1, b1, w2, b2

    # 1) f32, C=64 (lane-fold k=2): single-pass fast path.
    x, w1, b1, w2, b2 = make_inputs(0, 2, 8, 8, 64, 16, jnp.float32)
    ref = se_reference(x, w1, b1, w2, b2)
    out = jax.block_until_ready(se_forward(x, w1, b1, w2, b2))
    if not jnp.allclose(out, ref, atol=1e-4, rtol=1e-4):
        raise AssertionError("single-pass Pallas SE kernel does not match reference")

    # 2) Tiled two-pass fallback, auto tile picker.
    out_t = jax.block_until_ready(se_forward(x, w1, b1, w2, b2, force_tiled=True))
    if not jnp.allclose(out_t, ref, atol=1e-4, rtol=1e-4):
        raise AssertionError("tiled (auto) Pallas SE kernel does not match reference")

    # 3) Tiled two-pass fallback with an explicit small tile.
    out_t8 = jax.block_until_ready(
        se_forward(x, w1, b1, w2, b2, force_tiled=True, tile_rows=8))
    if not jnp.allclose(out_t8, ref, atol=1e-4, rtol=1e-4):
        raise AssertionError("tiled (tile_rows=8) Pallas SE kernel does not match reference")

    # 4) Generalized lane fold: C=96 -> k=4, L=384 (multiple of 128).
    x96, w1_96, b1_96, w2_96, b2_96 = make_inputs(0, 2, 8, 8, 96, 16, jnp.float32)
    ref96 = se_reference(x96, w1_96, b1_96, w2_96, b2_96)
    out96 = jax.block_until_ready(se_forward(x96, w1_96, b1_96, w2_96, b2_96))
    if not jnp.allclose(out96, ref96, atol=1e-4, rtol=1e-4):
        raise AssertionError("C=96 lane-fold Pallas SE kernel does not match reference")

    # 5) bf16 inputs (gate cast to bf16 before the multiply -> a couple of ulps).
    xb = x.astype(jnp.bfloat16)
    refb = se_reference(xb, w1, b1, w2, b2).astype(jnp.float32)
    outb = jax.block_until_ready(se_forward(xb, w1, b1, w2, b2)).astype(jnp.float32)
    if not jnp.allclose(outb, refb, atol=5e-2, rtol=5e-2):
        raise AssertionError("bf16 Pallas SE kernel does not match reference")

    print("KERNEL_OK")
</pallas_src>

<mosaic_0001>
module attributes {stable_mosaic.version = 11 : i64} {
  func.func @_se_single_pass_kernel(%arg0: i32, %arg1: memref<1x32x128xf32, #tpu.memory_space<vmem>>, %arg2: memref<128x4xf32, #tpu.memory_space<vmem>>, %arg3: memref<1x4xf32, #tpu.memory_space<vmem>>, %arg4: memref<4x128xf32, #tpu.memory_space<vmem>>, %arg5: memref<1x128xf32, #tpu.memory_space<vmem>>, %arg6: memref<1x32x128xf32, #tpu.memory_space<vmem>>) attributes {dimension_semantics = [#tpu.dimension_semantics<parallel>], iteration_bounds = array<i64: 2>, scalar_prefetch = 0 : i64, scratch_operands = 0 : i64, tpu.core_type = #tpu.core_type<tc>, window_params = [{transform_indices = @transform_0, window_bounds = array<i64: 1, 32, 128>}, {pipeline_mode = #tpu.pipeline_mode<synchronous>, transform_indices = @transform_1, window_bounds = array<i64: 128, 4>}, {pipeline_mode = #tpu.pipeline_mode<synchronous>, transform_indices = @transform_2, window_bounds = array<i64: 1, 4>}, {pipeline_mode = #tpu.pipeline_mode<synchronous>, transform_indices = @transform_3, window_bounds = array<i64: 4, 128>}, {pipeline_mode = #tpu.pipeline_mode<synchronous>, transform_indices = @transform_4, window_bounds = array<i64: 1, 128>}, {transform_indices = @transform_5, window_bounds = array<i64: 1, 32, 128>}]} {
    %c0 = arith.constant 0 : index
    %c0_0 = arith.constant 0 : index
    %c0_1 = arith.constant 0 : index
    %0 = vector.load %arg1[%c0, %c0_0, %c0_1] : memref<1x32x128xf32, #tpu.memory_space<vmem>>, vector<1x32x128xf32>
    %cst = arith.constant dense<0.000000e+00> : vector<1x128xf32>
    %1 = vector.multi_reduction <add>, %0, %cst [1] : vector<1x32x128xf32> to vector<1x128xf32>
    %c0_2 = arith.constant 0 : index
    %c0_3 = arith.constant 0 : index
    %2 = vector.load %arg2[%c0_2, %c0_3] : memref<128x4xf32, #tpu.memory_space<vmem>>, vector<128x4xf32>
    %cst_4 = arith.constant dense<0.000000e+00> : vector<1x4xf32>
    %3 = tpu.matmul %1, %2, %cst_4 {dimension_numbers = #tpu.dot_dimension_numbers<[1], [0], [0], [1], [0, 0, 1, 1], [], []>} : vector<1x128xf32>, vector<128x4xf32>, vector<1x4xf32> -> vector<1x4xf32>
    %c0_5 = arith.constant 0 : index
    %c0_6 = arith.constant 0 : index
    %4 = vector.load %arg3[%c0_5, %c0_6] : memref<1x4xf32, #tpu.memory_space<vmem>>, vector<1x4xf32>
    %5 = arith.addf %3, %4 : vector<1x4xf32>
    %cst_7 = arith.constant 0.000000e+00 : f32
    %6 = vector.broadcast %cst_7 : f32 to vector<1x4xf32>
    %7 = arith.maximumf %5, %6 : vector<1x4xf32>
    %c0_8 = arith.constant 0 : index
    %c0_9 = arith.constant 0 : index
    %8 = vector.load %arg4[%c0_8, %c0_9] : memref<4x128xf32, #tpu.memory_space<vmem>>, vector<4x128xf32>
    %cst_10 = arith.constant dense<0.000000e+00> : vector<1x128xf32>
    %9 = tpu.matmul %7, %8, %cst_10 {dimension_numbers = #tpu.dot_dimension_numbers<[1], [0], [0], [1], [0, 0, 1, 1], [], []>} : vector<1x4xf32>, vector<4x128xf32>, vector<1x128xf32> -> vector<1x128xf32>
    %c0_11 = arith.constant 0 : index
    %c0_12 = arith.constant 0 : index
    %10 = vector.load %arg5[%c0_11, %c0_12] : memref<1x128xf32, #tpu.memory_space<vmem>>, vector<1x128xf32>
    %11 = arith.addf %9, %10 : vector<1x128xf32>
    %c0_13 = arith.constant 0 : index
    %c0_14 = arith.constant 0 : index
    %c0_15 = arith.constant 0 : index
    %12 = vector.load %arg1[%c0_13, %c0_14, %c0_15] : memref<1x32x128xf32, #tpu.memory_space<vmem>>, vector<1x32x128xf32>
    %13 = vector.shape_cast %11 : vector<1x128xf32> to vector<1x1x128xf32>
    %14 = vector.broadcast %13 : vector<1x1x128xf32> to vector<1x32x128xf32>
    %15 = arith.mulf %12, %14 : vector<1x32x128xf32>
    %c0_16 = arith.constant 0 : index
    %c0_17 = arith.constant 0 : index
    %c0_18 = arith.constant 0 : index
    %16 = vector.load %arg6[%c0_16, %c0_17, %c0_18] : memref<1x32x128xf32, #tpu.memory_space<vmem>>, vector<1x32x128xf32>
    tpu.vector_store %arg6[%c0_16, %c0_17, %c0_18], %15 {strides = array<i32>} : memref<1x32x128xf32, #tpu.memory_space<vmem>>, vector<1x32x128xf32>,
    return
  }
  func.func @transform_0(%arg0: i32) -> (i32, i32, i32) {
    %c0_i32 = arith.constant 0 : i32
    %c0_i32_0 = arith.constant 0 : i32
    %c0_i32_1 = arith.constant 0 : i32
    return %arg0, %c0_i32, %c0_i32_0 : i32, i32, i32
  }
  func.func @transform_1(%arg0: i32) -> (i32, i32) {
    %c0_i32 = arith.constant 0 : i32
    %c0_i32_0 = arith.constant 0 : i32
    %c0_i32_1 = arith.constant 0 : i32
    return %c0_i32, %c0_i32_0 : i32, i32
  }
  func.func @transform_2(%arg0: i32) -> (i32, i32) {
    %c0_i32 = arith.constant 0 : i32
    %c0_i32_0 = arith.constant 0 : i32
    %c0_i32_1 = arith.constant 0 : i32
    return %c0_i32, %c0_i32_0 : i32, i32
  }
  func.func @transform_3(%arg0: i32) -> (i32, i32) {
    %c0_i32 = arith.constant 0 : i32
    %c0_i32_0 = arith.constant 0 : i32
    %c0_i32_1 = arith.constant 0 : i32
    return %c0_i32, %c0_i32_0 : i32, i32
  }
  func.func @transform_4(%arg0: i32) -> (i32, i32) {
    %c0_i32 = arith.constant 0 : i32
    %c0_i32_0 = arith.constant 0 : i32
    %c0_i32_1 = arith.constant 0 : i32
    return %c0_i32, %c0_i32_0 : i32, i32
  }
  func.func @transform_5(%arg0: i32) -> (i32, i32, i32) {
    %c0_i32 = arith.constant 0 : i32
    %c0_i32_0 = arith.constant 0 : i32
    %c0_i32_1 = arith.constant 0 : i32
    return %arg0, %c0_i32, %c0_i32_0 : i32, i32, i32
  }
}

</mosaic_0001>

<bundles_post_ra>
// kernel: tpu_custom_call.1
= control target key start
LH: loop header
LB: loop body
LE: loop exit
PB: predicated region body
PF: predicated region fallthrough
CT: control target
= control target key end

     0   :  { %10 = vsyncpa [#allocation3], 0  ;;  %s907_s0 = inlined_call_operand.vmem [shape: f32[2,32,128], index: 0, kind: input, shape index: {}]   ;;  %s908_s1 = inlined_call_operand.vmem [shape: f32[128,4], index: 1, kind: input, shape index: {}]   ;;  %s909_s2 = inlined_call_operand.vmem [shape: f32[1,4], index: 2, kind: input, shape index: {}]   ;;  %s910_s3 = inlined_call_operand.vmem [shape: f32[4,128], index: 3, kind: input, shape index: {}]   ;;  %s911_s4 = inlined_call_operand.vmem [shape: f32[1,128], index: 4, kind: input, shape index: {}]   ;;  %s912_s5 = inlined_call_operand.hbm [shape: f32[2,32,128], index: 5, kind: output, shape index: {}]  }
   0x1   :  { %12 = vsyncpa [#allocation3 + $0x1], 0  ;;  %s735_s18 = smov 0   ;;  %s737_s19 = smov 0  }
   0x2   :  { %s739_s20 = smov 0   ;;  %s741_s21 = smov 0  }
   0x3 LB: > { %s756_s22 = sadd.s32 4294967295, %s697_s21   ;;  %s492_s23 = sadd.s32 4294967294, %s697_s21   ;;  %s697_s21 = sphi %s741_s21, %s918_s21   ;;  %s693_s20 = sphi %s739_s20, %s917_s20   ;;  %s689_s19 = sphi %s737_s19, %s916_s19   ;;  %s685_s18 = sphi %s735_s18, %s915_s18  }
   0x4   : > { %s760_s24 = sadd.s32 1, %s697_s21   ;;  %s135_s25 = sadd.s32 1, %s693_s20 }
   0x5   : > { %s132_s26 = ssub.s32 %s697_s21, %s760_s24  ;;  %p145_p0 = scmp.ne.s32.totalorder %s693_s20, %s689_s19 }
   0x6   : > { %p133_p1 = scmp.eq.s32.totalorder %s132_s26, 0  ;;  %p146_p2 = scmp.eq.s32.totalorder %s756_s22, 1 }
   0x7   : > { %p151_p3 = scmp.ne.s32.totalorder %s689_s19, %s685_s18  ;;  %p152_p4 = scmp.eq.s32.totalorder %s492_s23, 1 }
   0x8   : > { %s771_s27 = scalar_select %p133_p1, %s693_s20, %s135_s25  }
   0x9   : > { %p773_p5 = por %p146_p2, %p145_p0  ;;  %p777_p6 = por %p152_p4, %p151_p3 }
   0xa   : > { %p495_p7 = scmp.ge.s32.totalorder %s697_s21, 1  ;;  %p190_p8 = scmp.lt.s32.totalorder %s697_s21, 3 }
   0xc   : > { %p191_p9 = pnand %p495_p7, %p190_p8 }
   0xd   : > { %v236_v0 = vld [vmem:[%s908_s1] sm:$0xff] (!%p191_p9)  ;;  %v237_v1 = vld [vmem:[%s908_s1 + $0x8] sm:$0xff] (!%p191_p9)  ;;  %v238_v2 = vld [vmem:[%s908_s1 + $0x10] sm:$0xff] (!%p191_p9)  ;;  %v699_v3 = vmov (!%p191_p9), 0.0|0.0   ;;  %vm700_vm0 = vmmov (!%p191_p9), 0   ;;  %v701_v6 = vmov (!%p191_p9), 0.0   ;;  %v404_v45 = vlaneseq (!%p191_p9) }
   0xe   : > { %194 = sbr.rel (%p191_p9) target bundleno = 497 (0x1f1), region = 40  ;;  %567 = vmatprep.subr.bf16.mxu0 (!%p191_p9), %v699_v3  ;;  %v568_v4 = vpack.c.bf16 (!%p191_p9), %v237_v1, %v236_v0  ;;  %v239_v5 = vld [vmem:[%s908_s1 + $0x18] sm:$0xff] (!%p191_p9)  ;;  %559 = vmatprep.mubr.msk.f32.mxu0 (!%p191_p9), %vm700_vm0, %v701_v6  ;;  %p218_p10 = scmp.lt.s32.totalorder (!%p191_p9), %s756_s22, 1  ;;  %v240_v8 = vld [vmem:[%s908_s1 + $0x20] sm:$0xff] (!%p191_p9)  ;;  %v241_v9 = vld [vmem:[%s908_s1 + $0x28] sm:$0xff] (!%p191_p9)  ;;  %vm330_vm1 = vcmask (!%p191_p9), 1043456  }
   0xf   : > { %562 = vmatprep.subr.mxu1 (!%p191_p9), %v701_v6  ;;  %564 = vmatprep.mubr.msk.f32.mxu1 (!%p191_p9), %vm700_vm0, %v701_v6  ;;  %v571_v7 = vpack.c.bf16 (!%p191_p9), %v239_v5, %v238_v2  ;;  %v574_v10 = vpack.c.bf16 (!%p191_p9), %v241_v9, %v240_v8  ;;  %v242_v14 = vld [vmem:[%s908_s1 + $0x30] sm:$0xff] (!%p191_p9)  ;;  %v243_v15 = vld [vmem:[%s908_s1 + $0x38] sm:$0xff] (!%p191_p9)  ;;  %v244_v20 = vld [vmem:[%s908_s1 + $0x40] sm:$0xff] (!%p191_p9)  ;;  %vm326_vm2 = vcmask (!%p191_p9), 31744   ;;  %s215_s14 = sand.u32 (!%p191_p9), 1, %s689_s19   ;;  %v405_v46 = vshrl.u32 (!%p191_p9), %v404_v45, 7 }
  0x10   : > { %569 = vmatpush3.bf16.msra.mxu0 (!%p191_p9), %v568_v4  ;;  %v577_v19 = vpack.c.bf16 (!%p191_p9), %v243_v15, %v242_v14  ;;  %v245_v21 = vld [vmem:[%s908_s1 + $0x48] sm:$0xff] (!%p191_p9)  ;;  %v246_v25 = vld [vmem:[%s908_s1 + $0x50] sm:$0xff] (!%p191_p9)  ;;  %v247_v26 = vld [vmem:[%s908_s1 + $0x58] sm:$0xff] (!%p191_p9)  ;;  %s496_s15 = sshll.u32 (!%p191_p9), %s215_s14, 5  ;;  %s702_s9 = smov (!%p191_p9), [#allocation2]  }
  0x11   : > { %570 = vmatprep.subr.bf16.mxu0 (!%p191_p9), %v699_v3  ;;  %v580_v24 = vpack.c.bf16 (!%p191_p9), %v245_v21, %v244_v20  ;;  %v583_v29 = vpack.c.bf16 (!%p191_p9), %v247_v26, %v246_v25  ;;  %v248_v30 = vld [vmem:[%s908_s1 + $0x60] sm:$0xff] (!%p191_p9)  ;;  %v249_v31 = vld [vmem:[%s908_s1 + $0x68] sm:$0xff] (!%p191_p9)  ;;  %v250_v34 = vld [vmem:[%s908_s1 + $0x70] sm:$0xff] (!%p191_p9)  ;;  %v406_v48 = vsub.s32 (!%p191_p9), 0, %v405_v46  ;;  %s217_s25 = scalar_lea.vmem (!%p191_p9), [#allocation2], %s496_s15  ;;  %s639_s10 = sshll.u32 (!%p191_p9), %s702_s9, 4  ;;  %s640_s10 = int_to_ptr.vmem [resolvable:$false] %s639_s10 }
  0x12   : > { %v586_v33 = vpack.c.bf16 (!%p191_p9), %v249_v31, %v248_v30  ;;  %v251_v35 = vld [vmem:[%s908_s1 + $0x78] sm:$0xff] (!%p191_p9)  ;;  %v324_v39 = vld [vmem:[%s910_s3] sm:$0xf] (!%p191_p9)  ;;  %s430_s26 = sshll.u32 (!%p191_p9), %s217_s25, 4  ;;  %s641_s11 = scalar_lea.vmem (!%p191_p9), %s640_s10, 1024  ;;  %s861_s26 = int_to_ptr.vmem [resolvable:$true] %s430_s26 }
  0x13   : > { %v589_v37 = vpack.c.bf16 (!%p191_p9), %v251_v35, %v250_v34  ;;  %563 = vmatpush3.msk.msra.mxu1 (!%p191_p9), %vm330_vm1, %v324_v39  ;;  %v252_v40 = vld [vmem:[%s909_s2] sm:$0x1] (!%p191_p9)  ;;  %s635_s8 = scalar_lea.vmem (!%p191_p9), %s861_s26, 512  ;;  %p642_p0 = scmp.lt.s32.totalorder (!%p191_p9), %s861_s26, %s640_s10 }
  0x14   : > { %572 = vmatpush3.bf16.msra.mxu0 (!%p191_p9), %v571_v7  ;;  %v325_v47 = vld [vmem:[%s911_s4] sm:$0x1] (!%p191_p9)  ;;  %p636_p11 = scmp.ne.s32.totalorder (!%p191_p9), %s861_s26, %s635_s8  ;;  %p643_p1 = scmp.lt.s32.totalorder (!%p191_p9), %s641_s11, %s635_s8 }
  0x15   : > { %s219_s13 = scalar_select %p218_p10, %s756_s22, 1  ;;  %573 = vmatprep.subr.bf16.mxu0 %v699_v3 }
  0x16   : > { %p637_p12 = pnand %p636_p11, %p773_p5  ;;  %p644_p2 = por %p643_p1, %p642_p0 }
  0x17   : > { %s506_s23 = sshll.u32 %s219_s13, 5 }
  0x18   : > { %s222_s30 = scalar_lea.vmem %s907_s0, %s506_s23  ;;  %575 = vmatpush3.bf16.msra.mxu0 %v574_v10  ;;  %s507_s23 = sshll.u32 %s756_s22, 9 }
  0x19   : > { %v806_v11 = vld [vmem:[%s222_s30] sm:$0xff]  ;;  %v808_v12 = vld [vmem:[%s222_s30 + $0x8] sm:$0xff]  ;;  %v810_v13 = vld [vmem:[%s222_s30 + $0x10] sm:$0xff]  ;;  %576 = vmatprep.subr.bf16.mxu0 %v699_v3  ;;  %s859_s7 = scalar_lea.hbm %s912_s5, %s507_s23  ;;  %s866_s22 = scalar_lea.sflag [#allocation3], %s215_s14 }
  0x1a   : > { %v227_v16 = vadd.f32 %v808_v12, %v806_v11  ;;  %v226_v17 = vld [vmem:[%s222_s30 + $0x18] sm:$0xff]  ;;  %p638_p13 = pneg %p637_p12 }
  0x1c   : > { %v228_v18 = vadd.f32 %v227_v16, %v810_v13  ;;  %578 = vmatpush3.bf16.msra.mxu0 %v577_v19  ;;  %p645_p3 = pnand %p644_p2, %p638_p13 }
  0x1d   : > { %579 = vmatprep.subr.bf16.mxu0 %v699_v3 }
  0x1e   : > { %v229_v22 = vadd.f32 %v228_v18, %v226_v17 }
  0x20   : > { %v230_v23 = vrot.slane %v229_v22, 4  ;;  %581 = vmatpush3.bf16.msra.mxu0 %v580_v24 }
  0x21   : > { %582 = vmatprep.subr.bf16.mxu0 %v699_v3 }
  0x22   : > { %v231_v27 = vadd.f32 %v230_v23, %v229_v22 }
  0x24   : > { %v232_v28 = vrot.slane %v231_v27, 2  ;;  %584 = vmatpush3.bf16.msra.mxu0 %v583_v29 }
  0x25   : > { %585 = vmatprep.subr.bf16.mxu0 %v699_v3 }
  0x26   : > { %v233_v32 = vadd.f32 %v232_v28, %v231_v27 }
  0x28   : > { %v234_v36 = vrot.slane %v233_v32, 1  ;;  %587 = vmatpush3.bf16.msra.mxu0 %v586_v33 }
  0x29   : > { %588 = vmatprep.subr.bf16.mxu0 %v699_v3 }
  0x2a   : > { %v235_v38 = vadd.f32 %v234_v36, %v233_v32 }
  0x2c   : > { %590 = vmatpush3.bf16.msra.mxu0 %v589_v37 }
  0x2f   : > { %560 = vmatmul.mubr.f32.vlgmr.msra.gmra.mrb[0].mxu0 %v235_v38 }
 0x102   : > { %v319_v41 = vpop.f32.mrb[0].mxu0 }
 0x103   : > { %v320_v42 = vadd.f32 %v319_v41, %v252_v40  ;;  %v561_v43 = vpop.f32.mrb[1].mxu0 }
 0x105   : > { %v323_v44 = vmax.f32 %v320_v42, 0.0 }
 0x107   : > { %565 = vmatmul.mubr.msk.f32.vlgmr.msra.gmra.mrb[0].mxu1 %vm326_vm2, %v323_v44 }
 0x1da   : > { %v400_v49 = vpop.f32.mrb[0].mxu1 }
 0x1db   : > { %v401_v50 = vadd.f32 %v400_v49, %v325_v47  ;;  %v566_v51 = vpop.f32.mrb[1].mxu1 }
 0x1dd   : > { %v407_v52 = vrot.slane %v401_v50, %v406_v48 }
 0x1df   : > { %v408_v53 = vmul.f32 %v407_v52, %v806_v11  ;;  %v409_v54 = vmul.f32 %v407_v52, %v808_v12  ;;  %v410_v55 = vmul.f32 %v407_v52, %v810_v13  ;;  %v411_v56 = vmul.f32 %v407_v52, %v226_v17 }
 0x1e1   : > { %412 = vst [vmem:[%s217_s25] sm:$0xff] %v408_v53  ;;  %413 = vst [vmem:[%s217_s25 + $0x8] sm:$0xff] %v409_v54 }
 0x1e2   : > { %414 = vst [vmem:[%s217_s25 + $0x10] sm:$0xff] %v410_v55  ;;  %415 = vst [vmem:[%s217_s25 + $0x18] sm:$0xff] %v411_v56 }
 0x1e3   : > { %648 = shalt.err (!%p645_p3)
}
 0x1e4   : > { %s649_s12 = scalar_lea.hbm %s859_s7, 512  ;;  %s653_s15 = scalar_lea.hbm %s912_s5, 1024 }
 0x1e5   : > { %p650_p4 = scmp.ne.s32.totalorder %s859_s7, %s649_s12  ;;  %p654_p9 = scmp.lt.u32.totalorder %s859_s7, %s912_s5 }
 0x1e6   : > { %p655_p10 = scmp.lt.u32.totalorder %s653_s15, %s649_s12  ;;  %p657_p12 = scmp.lt.u32.totalorder %s649_s12, %s859_s7 }
 0x1e7   : > { %p651_p7 = pnand %p650_p4, %p773_p5 }
 0x1e8   : > { %p656_p11 = por %p655_p10, %p654_p9 }
 0x1e9   : > { %p652_p8 = pneg %p651_p7 }
 0x1ea   : > { %p658_p13 = por %p657_p12, %p656_p11 }
 0x1ec   : > { %p659_p0 = pnand %p658_p13, %p652_p8 }
 0x1ee   : > { %662 = shalt.err (!%p659_p0)
}
 0x1ef   : > { %s703_s23 = smov 128   ;;  %s704_s25 = smov 8  }
 0x1f0   : > { %591 = dma.vmem_to_hbm [thread:$0]  (%p773_p5), %s861_s26, 512, %s859_s7, %s866_s22, %s703_s23, %s703_s23, %s704_s25  }
 0x1f1 PF: > { %p597_p1 = scmp.ge.s32.totalorder %s697_s21, 2  ;;  %s445_s30 = sand.u32 1, %s685_s18  }
 0x1f2   : > { %s446_s6 = scalar_lea.sflag [#allocation3], %s445_s30 }
 0x1f3   : > { %p594_p2 = pnand %p597_p1, %p777_p6 }
 0x1f5   : > { %680 = dma.done.wait (!%p594_p2), %s446_s6, 512  }
 0x1f6   : > { %682 = vsyncadd (!%p594_p2), %s446_s6, 4294966784  ;;  %p15_p3 = scmp.ge.s32.totalorder %s760_s24, 4   ;;  %s915_s18 = smov %s689_s19 }
 0x1f7   : > { %s916_s19 = smov %s693_s20  ;;  %s917_s20 = smov %s771_s27 }
 0x1f8   : > { %s918_s21 = smov %s760_s24  ;;  %17 = sbr.rel (!%p15_p3) target bundleno = 3 (0x3), region = 75 }
 0x1ff   :  { %451 = vsyncpa [#allocation3], 1 }
 0x200   :  { %453 = vsyncpa [#allocation3 + $0x1], 1 }

</bundles_post_ra>
